<compile_context>
chip_gen: v5e
topology: v5e:2x2
jax: 0.10.0
libtpu: 0.0.40
codegen_flags: <defaults>
</compile_context>

<pallas_src>
import jax
import jax.numpy as jnp
from jax import lax
from jax.experimental import pallas as pl
from jax.experimental.pallas import tpu as pltpu


def _round_up(n, m):
    return ((n + m - 1) // m) * m


def _velocity_field_kernel(x_ref, w1T_ref, b1_ref, w2T_ref, b2_ref, oT_ref):
    # x_ref  : (TB, D)  — batch-major, native layout, streamed over the batch grid
    # w1T_ref: (H, D)   — VMEM-resident across grid steps
    # b1_ref : (H, 1)
    # w2T_ref: (D, H)
    # b2_ref : (D, 1)
    # oT_ref : (D, TB)  — batch on the lane axis -> unmasked, lane-dense stores
    x = x_ref[...]
    w1T = w1T_ref[...]
    # MXU matmul #1: contract D of W1^T (H, D) with D of x (TB, D) -> (H, TB).
    # The transposed-RHS access is handled inside the kernel (no wrapper x.T pass).
    h = lax.dot_general(
        w1T, x.astype(w1T.dtype),
        dimension_numbers=(((1,), (1,)), ((), ())),
        preferred_element_type=jnp.float32,
    )
    h = jnp.tanh(h + b1_ref[...])            # EUP tanh, lane-dense over TB lanes
    # MXU matmul #2: (D, H) @ (H, TB) -> (D, TB), f32 accumulation.
    w2T = w2T_ref[...]
    out = jnp.dot(w2T, h.astype(w2T.dtype), preferred_element_type=jnp.float32)
    oT_ref[...] = (out + b2_ref[...]).astype(oT_ref.dtype)


def t_velocity_field(t, x, w1, b1, w2, b2, *,
                     tb_max=8192, single_tile_max=2048, param_dtype=None):
    """Forward of T_VelocityField: returns V(x); `t` is unused (V is time-independent)."""
    del t  # T_VelocityField.forward ignores t
    B, D = x.shape
    H = w1.shape[1]

    # Batch tile must be a multiple of 128 (lane width); round tb_max down, floor 128.
    tb_max = max(128, (tb_max // 128) * 128)
    single_tile_max = max(128, (single_tile_max // 128) * 128)

    Bp = _round_up(B, 128)
    if Bp <= min(single_tile_max, tb_max):
        # Small batch: whole problem in one block, one grid step, no streaming.
        TB = Bp
    else:
        # Large batch: keep >= 2 tiles so the "parallel" axis shards across v7x's
        # 2 TensorCores, capped at tb_max (tiles stay tiny vs. VMEM on all chips).
        TB = min(tb_max, _round_up(pl.cdiv(Bp, 2), 128))
    num_tiles = pl.cdiv(B, TB)

    # Tiny one-time parameter plumbing (a few KB at most — negligible).
    w1T = w1.T                                  # (H, D)
    w2T = w2.T                                  # (D, H)
    if param_dtype is not None:                 # bf16 weights: MXU-native on v6e/v7x
        w1T = w1T.astype(param_dtype)
        w2T = w2T.astype(param_dtype)
    b1c = b1.reshape(H, 1).astype(jnp.float32)
    b2c = b2.reshape(D, 1).astype(jnp.float32)

    resident = lambda shape: pl.BlockSpec(shape, lambda i: (0, 0))

    oT = pl.pallas_call(
        _velocity_field_kernel,
        out_shape=jax.ShapeDtypeStruct((D, B), x.dtype),
        grid=(num_tiles,),
        in_specs=[
            pl.BlockSpec((TB, D), lambda i: (i, 0)),   # x: native layout, streamed;
                                                       # partial last block edge-masked
            resident((H, D)),                          # W1^T (stays in VMEM)
            resident((H, 1)),                          # b1
            resident((D, H)),                          # W2^T
            resident((D, 1)),                          # b2
        ],
        out_specs=pl.BlockSpec((D, TB), lambda i: (0, i)),   # lane-dense output slab
        compiler_params=pltpu.CompilerParams(
            # Batch axis is embarrassingly parallel -> shards across 2 TCs on v7x.
            dimension_semantics=("parallel",),
        ),
    )(x, w1T, b1c, w2T, b2c)

    # Single small layout pass back to the PyTorch-compatible (B, D) interface.
    # TODO(synk): callers that can keep activations in (D, B) end-to-end can drop this.
    return oT.T


if __name__ == "__main__":
    key = jax.random.PRNGKey(0)
    D, H = 16, 32
    k_x, k_w1, k_b1, k_w2, k_b2, k_x2 = jax.random.split(key, 6)

    w1 = jax.random.normal(k_w1, (D, H), dtype=jnp.float32) * 0.1
    b1 = jax.random.normal(k_b1, (H,), dtype=jnp.float32) * 0.1
    w2 = jax.random.normal(k_w2, (H, D), dtype=jnp.float32) * 0.1
    b2 = jax.random.normal(k_b2, (D,), dtype=jnp.float32) * 0.1
    t = jnp.float32(0.5)  # ignored, mirrors the PyTorch forward(t, x) signature

    # Small non-multiple-of-128 batch -> single grid step (TB=512, grid=(1,)),
    # edge-masked tail rows (no wrapper pad/transpose passes on the input).
    B = 500
    x = jax.random.normal(k_x, (B, D), dtype=jnp.float32)
    ref = jnp.tanh(x @ w1 + b1) @ w2 + b2
    out = jax.block_until_ready(t_velocity_field(t, x, w1, b1, w2, b2))
    assert out.shape == (B, D)
    assert jnp.allclose(out, ref, atol=1e-4, rtol=1e-4)

    # Larger batch -> 2 tiles of 2048 (so the "parallel" axis can use both v7x TCs),
    # with a masked partial edge block (4000 is not a multiple of 2048).
    B2 = 4000
    x2 = jax.random.normal(k_x2, (B2, D), dtype=jnp.float32)
    ref2 = jnp.tanh(x2 @ w1 + b1) @ w2 + b2
    out2 = jax.block_until_ready(t_velocity_field(t, x2, w1, b1, w2, b2))
    assert out2.shape == (B2, D)
    assert jnp.allclose(out2, ref2, atol=1e-4, rtol=1e-4)

    # bf16-weight path (MXU-native on v6e/v7x); activations are cast to bf16 for the
    # MXU passes too, accumulation stays f32 — hence the looser tolerance.
    out_bf16 = jax.block_until_ready(
        t_velocity_field(t, x, w1, b1, w2, b2, param_dtype=jnp.bfloat16))
    assert out_bf16.shape == (B, D)
    assert jnp.allclose(out_bf16, ref, atol=5e-2, rtol=5e-2)

    print("KERNEL_OK")
</pallas_src>

<mosaic_0001>
module attributes {stable_mosaic.version = 11 : i64} {
  func.func @_velocity_field_kernel(%arg0: i32, %arg1: memref<512x16xf32, #tpu.memory_space<vmem>>, %arg2: memref<32x16xf32, #tpu.memory_space<vmem>>, %arg3: memref<32x1xf32, #tpu.memory_space<vmem>>, %arg4: memref<16x32xf32, #tpu.memory_space<vmem>>, %arg5: memref<16x1xf32, #tpu.memory_space<vmem>>, %arg6: memref<16x512xf32, #tpu.memory_space<vmem>>) attributes {dimension_semantics = [#tpu.dimension_semantics<parallel>], iteration_bounds = array<i64: 1>, scalar_prefetch = 0 : i64, scratch_operands = 0 : i64, tpu.core_type = #tpu.core_type<tc>, window_params = [{transform_indices = @transform_0, window_bounds = array<i64: 512, 16>}, {pipeline_mode = #tpu.pipeline_mode<synchronous>, transform_indices = @transform_1, window_bounds = array<i64: 32, 16>}, {pipeline_mode = #tpu.pipeline_mode<synchronous>, transform_indices = @transform_2, window_bounds = array<i64: 32, 1>}, {pipeline_mode = #tpu.pipeline_mode<synchronous>, transform_indices = @transform_3, window_bounds = array<i64: 16, 32>}, {pipeline_mode = #tpu.pipeline_mode<synchronous>, transform_indices = @transform_4, window_bounds = array<i64: 16, 1>}, {transform_indices = @transform_5, window_bounds = array<i64: 16, 512>}]} {
    %c0 = arith.constant 0 : index
    %c0_0 = arith.constant 0 : index
    %0 = vector.load %arg1[%c0, %c0_0] : memref<512x16xf32, #tpu.memory_space<vmem>>, vector<512x16xf32>
    %c0_1 = arith.constant 0 : index
    %c0_2 = arith.constant 0 : index
    %1 = vector.load %arg2[%c0_1, %c0_2] : memref<32x16xf32, #tpu.memory_space<vmem>>, vector<32x16xf32>
    %cst = arith.constant dense<0.000000e+00> : vector<32x512xf32>
    %2 = tpu.matmul %1, %0, %cst {dimension_numbers = #tpu.dot_dimension_numbers<[1], [1], [0], [0], [0, 0, 1, 0], [], []>} : vector<32x16xf32>, vector<512x16xf32>, vector<32x512xf32> -> vector<32x512xf32>
    %c0_3 = arith.constant 0 : index
    %c0_4 = arith.constant 0 : index
    %3 = vector.load %arg3[%c0_3, %c0_4] : memref<32x1xf32, #tpu.memory_space<vmem>>, vector<32x1xf32>
    %4 = vector.broadcast %3 : vector<32x1xf32> to vector<32x512xf32>
    %5 = arith.addf %2, %4 : vector<32x512xf32>
    %6 = math.tanh %5 : vector<32x512xf32>
    %c0_5 = arith.constant 0 : index
    %c0_6 = arith.constant 0 : index
    %7 = vector.load %arg4[%c0_5, %c0_6] : memref<16x32xf32, #tpu.memory_space<vmem>>, vector<16x32xf32>
    %cst_7 = arith.constant dense<0.000000e+00> : vector<16x512xf32>
    %8 = tpu.matmul %7, %6, %cst_7 {dimension_numbers = #tpu.dot_dimension_numbers<[1], [0], [0], [1], [0, 0, 1, 1], [], []>} : vector<16x32xf32>, vector<32x512xf32>, vector<16x512xf32> -> vector<16x512xf32>
    %c0_8 = arith.constant 0 : index
    %c0_9 = arith.constant 0 : index
    %9 = vector.load %arg5[%c0_8, %c0_9] : memref<16x1xf32, #tpu.memory_space<vmem>>, vector<16x1xf32>
    %10 = vector.broadcast %9 : vector<16x1xf32> to vector<16x512xf32>
    %11 = arith.addf %8, %10 : vector<16x512xf32>
    %c0_10 = arith.constant 0 : index
    %c0_11 = arith.constant 0 : index
    %12 = vector.load %arg6[%c0_10, %c0_11] : memref<16x512xf32, #tpu.memory_space<vmem>>, vector<16x512xf32>
    tpu.vector_store %arg6[%c0_10, %c0_11], %11 {strides = array<i32>} : memref<16x512xf32, #tpu.memory_space<vmem>>, vector<16x512xf32>,
    return
  }
  func.func @transform_0(%arg0: i32) -> (i32, i32) {
    %c0_i32 = arith.constant 0 : i32
    %c0_i32_0 = arith.constant 0 : i32
    return %arg0, %c0_i32 : i32, i32
  }
  func.func @transform_1(%arg0: i32) -> (i32, i32) {
    %c0_i32 = arith.constant 0 : i32
    %c0_i32_0 = arith.constant 0 : i32
    %c0_i32_1 = arith.constant 0 : i32
    return %c0_i32, %c0_i32_0 : i32, i32
  }
  func.func @transform_2(%arg0: i32) -> (i32, i32) {
    %c0_i32 = arith.constant 0 : i32
    %c0_i32_0 = arith.constant 0 : i32
    %c0_i32_1 = arith.constant 0 : i32
    return %c0_i32, %c0_i32_0 : i32, i32
  }
  func.func @transform_3(%arg0: i32) -> (i32, i32) {
    %c0_i32 = arith.constant 0 : i32
    %c0_i32_0 = arith.constant 0 : i32
    %c0_i32_1 = arith.constant 0 : i32
    return %c0_i32, %c0_i32_0 : i32, i32
  }
  func.func @transform_4(%arg0: i32) -> (i32, i32) {
    %c0_i32 = arith.constant 0 : i32
    %c0_i32_0 = arith.constant 0 : i32
    %c0_i32_1 = arith.constant 0 : i32
    return %c0_i32, %c0_i32_0 : i32, i32
  }
  func.func @transform_5(%arg0: i32) -> (i32, i32) {
    %c0_i32 = arith.constant 0 : i32
    %c0_i32_0 = arith.constant 0 : i32
    return %c0_i32, %arg0 : i32, i32
  }
}

</mosaic_0001>

<bundles_post_ra>
// kernel: tpu_custom_call.1
= control target key start
LH: loop header
LB: loop body
LE: loop exit
PB: predicated region body
PF: predicated region fallthrough
CT: control target
= control target key end

     0   :  { %vm113_vm0 = vcmask 130048   ;;  %s1095_s0 = inlined_call_operand.vmem [shape: f32[500,16], index: 0, kind: input, shape index: {}]   ;;  %s1096_s1 = inlined_call_operand.vmem [shape: f32[32,16], index: 1, kind: input, shape index: {}]   ;;  %s1097_s2 = inlined_call_operand.vmem [shape: f32[32,1], index: 2, kind: input, shape index: {}]   ;;  %s1098_s3 = inlined_call_operand.vmem [shape: f32[16,32], index: 3, kind: input, shape index: {}]   ;;  %s1099_s4 = inlined_call_operand.vmem [shape: f32[16,1], index: 4, kind: input, shape index: {}]   ;;  %s1100_s5 = inlined_call_operand.hbm [shape: f32[16,500], index: 5, kind: output, shape index: {}]  }
   0x1   :  { %v36_v0 = vld [vmem:[%s1095_s0 + $0x78] sm:$0xff]  ;;  %v35_v4 = vld [vmem:[%s1095_s0 + $0x70] sm:$0xff]  ;;  %v34_v8 = vld [vmem:[%s1095_s0 + $0x68] sm:$0xff] }
   0x2   :  { %v52_v1 = vld [vmem:[%s1095_s0 + $0xf8] sm:$0xff]  ;;  %589 = vmatpush.xpose.msk.msra.mxu0 %vm113_vm0, %v36_v0  ;;  %v51_v5 = vld [vmem:[%s1095_s0 + $0xf0] sm:$0xff]  ;;  %v50_v9 = vld [vmem:[%s1095_s0 + $0xe8] sm:$0xff] }
   0x3   :  { %v68_v2 = vld [vmem:[%s1095_s0 + $0x178] sm:$0xff]  ;;  %609 = vmatpush.xpose.msk.msra.mxu1 %vm113_vm0, %v52_v1  ;;  %v67_v6 = vld [vmem:[%s1095_s0 + $0x170] sm:$0xff]  ;;  %v66_v10 = vld [vmem:[%s1095_s0 + $0x168] sm:$0xff] }
   0x4   :  { %v84_v3 = vld [vmem:[%s1095_s0 + $0x1f8] sm:$0xff]  ;;  %629 = vmatpush.xpose.msk.msra.mxu2 %vm113_vm0, %v68_v2  ;;  %v83_v7 = vld [vmem:[%s1095_s0 + $0x1f0] sm:$0xff]  ;;  %v82_v11 = vld [vmem:[%s1095_s0 + $0x1e8] sm:$0xff] }
   0x5   :  { %649 = vmatpush.xpose.msk.msra.mxu3 %vm113_vm0, %v84_v3  ;;  %v33_v12 = vld [vmem:[%s1095_s0 + $0x60] sm:$0xff]  ;;  %v32_v16 = vld [vmem:[%s1095_s0 + $0x58] sm:$0xff] }
   0x6   :  { %590 = vmatpush.xpose.msk.msra.mxu0 %vm113_vm0, %v35_v4  ;;  %v49_v13 = vld [vmem:[%s1095_s0 + $0xe0] sm:$0xff]  ;;  %v48_v17 = vld [vmem:[%s1095_s0 + $0xd8] sm:$0xff] }
   0x7   :  { %610 = vmatpush.xpose.msk.msra.mxu1 %vm113_vm0, %v51_v5  ;;  %v65_v14 = vld [vmem:[%s1095_s0 + $0x160] sm:$0xff]  ;;  %v64_v18 = vld [vmem:[%s1095_s0 + $0x158] sm:$0xff] }
   0x8   :  { %630 = vmatpush.xpose.msk.msra.mxu2 %vm113_vm0, %v67_v6  ;;  %v81_v15 = vld [vmem:[%s1095_s0 + $0x1e0] sm:$0xff]  ;;  %v80_v19 = vld [vmem:[%s1095_s0 + $0x1d8] sm:$0xff] }
   0x9   :  { %650 = vmatpush.xpose.msk.msra.mxu3 %vm113_vm0, %v83_v7 }
   0xa   :  { %591 = vmatpush.xpose.msk.msra.mxu0 %vm113_vm0, %v34_v8 }
   0xb   :  { %611 = vmatpush.xpose.msk.msra.mxu1 %vm113_vm0, %v50_v9 }
   0xc   :  { %631 = vmatpush.xpose.msk.msra.mxu2 %vm113_vm0, %v66_v10 }
   0xd   :  { %651 = vmatpush.xpose.msk.msra.mxu3 %vm113_vm0, %v82_v11 }
   0xe   :  { %592 = vmatpush.xpose.msk.msra.mxu0 %vm113_vm0, %v33_v12 }
   0xf   :  { %612 = vmatpush.xpose.msk.msra.mxu1 %vm113_vm0, %v49_v13 }
  0x10   :  { %632 = vmatpush.xpose.msk.msra.mxu2 %vm113_vm0, %v65_v14 }
  0x11   :  { %652 = vmatpush.xpose.msk.msra.mxu3 %vm113_vm0, %v81_v15 }
  0x12   :  { %10 = vsyncpa [#allocation3], 0  ;;  %593 = vmatpush.xpose.msk.msra.mxu0 %vm113_vm0, %v32_v16  ;;  %v31_v20 = vld [vmem:[%s1095_s0 + $0x50] sm:$0xff]  ;;  %v30_v24 = vld [vmem:[%s1095_s0 + $0x48] sm:$0xff]  ;;  %v742_v40 = vmov 0   ;;  %vm464_vm1 = vcmask 261120  }
  0x13   :  { %613 = vmatpush.xpose.msk.msra.mxu1 %vm113_vm0, %v48_v17  ;;  %v47_v21 = vld [vmem:[%s1095_s0 + $0xd0] sm:$0xff]  ;;  %v46_v25 = vld [vmem:[%s1095_s0 + $0xc8] sm:$0xff]  ;;  %v29_v28 = vld [vmem:[%s1095_s0 + $0x40] sm:$0xff]  ;;  %682 = vset.pattern.permute.xlu1 %v742_v40  ;;  %s577_s19 = sshll.u32 %s1100_s5, 4  ;;  %s744_s20 = smov 512   ;;  %s578_s19 = int_to_ptr.hbm [resolvable:$true] %s577_s19 }
  0x14   :  { %633 = vmatpush.xpose.msk.msra.mxu2 %vm113_vm0, %v64_v18  ;;  %v63_v22 = vld [vmem:[%s1095_s0 + $0x150] sm:$0xff]  ;;  %v62_v26 = vld [vmem:[%s1095_s0 + $0x148] sm:$0xff]  ;;  %v45_v29 = vld [vmem:[%s1095_s0 + $0xc0] sm:$0xff]  ;;  %681 = vset.pattern.permute.xlu0 %v742_v40  ;;  %s745_s21 = smov 32  }
  0x15   :  { %653 = vmatpush.xpose.msk.msra.mxu3 %vm113_vm0, %v80_v19  ;;  %v79_v23 = vld [vmem:[%s1095_s0 + $0x1d0] sm:$0xff]  ;;  %v78_v27 = vld [vmem:[%s1095_s0 + $0x1c8] sm:$0xff]  ;;  %v61_v30 = vld [vmem:[%s1095_s0 + $0x140] sm:$0xff]  ;;  %683 = vset.pattern.permute.xlu2 %v742_v40 }
  0x16   :  { %594 = vmatpush.xpose.msk.msra.mxu0 %vm113_vm0, %v31_v20  ;;  %v77_v31 = vld [vmem:[%s1095_s0 + $0x1c0] sm:$0xff]  ;;  %v28_v32 = vld [vmem:[%s1095_s0 + $0x38] sm:$0xff]  ;;  %v27_v36 = vld [vmem:[%s1095_s0 + $0x30] sm:$0xff] }
  0x17   :  { %614 = vmatpush.xpose.msk.msra.mxu1 %vm113_vm0, %v47_v21  ;;  %v44_v33 = vld [vmem:[%s1095_s0 + $0xb8] sm:$0xff]  ;;  %v43_v37 = vld [vmem:[%s1095_s0 + $0xb0] sm:$0xff]  ;;  %v26_v41 = vld [vmem:[%s1095_s0 + $0x28] sm:$0xff] }
  0x18   :  { %634 = vmatpush.xpose.msk.msra.mxu2 %vm113_vm0, %v63_v22  ;;  %v60_v34 = vld [vmem:[%s1095_s0 + $0x138] sm:$0xff]  ;;  %v59_v38 = vld [vmem:[%s1095_s0 + $0x130] sm:$0xff]  ;;  %v42_v42 = vld [vmem:[%s1095_s0 + $0xa8] sm:$0xff] }
  0x19   :  { %654 = vmatpush.xpose.msk.msra.mxu3 %vm113_vm0, %v79_v23  ;;  %v76_v35 = vld [vmem:[%s1095_s0 + $0x1b8] sm:$0xff]  ;;  %v75_v39 = vld [vmem:[%s1095_s0 + $0x1b0] sm:$0xff]  ;;  %v58_v43 = vld [vmem:[%s1095_s0 + $0x128] sm:$0xff] }
  0x1a   :  { %595 = vmatpush.xpose.msk.msra.mxu0 %vm113_vm0, %v30_v24  ;;  %v74_v44 = vld [vmem:[%s1095_s0 + $0x1a8] sm:$0xff]  ;;  %v25_v46 = vld [vmem:[%s1095_s0 + $0x20] sm:$0xff]  ;;  %v24_v50 = vld [vmem:[%s1095_s0 + $0x18] sm:$0xff] }
  0x1b   :  { %615 = vmatpush.xpose.msk.msra.mxu1 %vm113_vm0, %v46_v25  ;;  %v90_v45 = vld [vmem:[%s1097_s2 + $0x8] sm:$0xff]  ;;  %v41_v47 = vld [vmem:[%s1095_s0 + $0xa0] sm:$0xff]  ;;  %v40_v51 = vld [vmem:[%s1095_s0 + $0x98] sm:$0xff] }
  0x1c   :  { %635 = vmatpush.xpose.msk.msra.mxu2 %vm113_vm0, %v62_v26  ;;  %v57_v48 = vld [vmem:[%s1095_s0 + $0x120] sm:$0xff]  ;;  %100 = vperm.xlu1 %682, %v90_v45   ;;  %v56_v52 = vld [vmem:[%s1095_s0 + $0x118] sm:$0xff]  ;;  %v23_v55 = vld [vmem:[%s1095_s0 + $0x10] sm:$0xff] }
  0x1d   :  { %655 = vmatpush.xpose.msk.msra.mxu3 %vm113_vm0, %v78_v27  ;;  %v73_v49 = vld [vmem:[%s1095_s0 + $0x1a0] sm:$0xff]  ;;  %v72_v53 = vld [vmem:[%s1095_s0 + $0x198] sm:$0xff]  ;;  %v39_v56 = vld [vmem:[%s1095_s0 + $0x90] sm:$0xff] }
  0x1e   :  { %596 = vmatpush.xpose.msk.msra.mxu0 %vm113_vm0, %v29_v28  ;;  %v89_v54 = vld [vmem:[%s1097_s2] sm:$0xff]  ;;  %v55_v57 = vld [vmem:[%s1095_s0 + $0x110] sm:$0xff]  ;;  %v22_v59 = vld [vmem:[%s1095_s0 + $0x8] sm:$0xff] }
  0x1f   :  { %616 = vmatpush.xpose.msk.msra.mxu1 %vm113_vm0, %v45_v29  ;;  %v71_v58 = vld [vmem:[%s1095_s0 + $0x190] sm:$0xff]  ;;  %v38_v60 = vld [vmem:[%s1095_s0 + $0x88] sm:$0xff]  ;;  %v92_v63 = vld [vmem:[%s1097_s2 + $0x18] sm:$0xff] }
  0x20   :  { %636 = vmatpush.xpose.msk.msra.mxu2 %vm113_vm0, %v61_v30  ;;  %v54_v61 = vld [vmem:[%s1095_s0 + $0x108] sm:$0xff]  ;;  %v21_v0 = vld [vmem:[%s1095_s0] sm:$0xff]  ;;  %110 = vperm.xlu0 %681, %v92_v63   ;;  %v91_v5 = vld [vmem:[%s1097_s2 + $0x10] sm:$0xff] }
  0x21   :  { %656 = vmatpush.xpose.msk.msra.mxu3 %vm113_vm0, %v77_v31  ;;  %v70_v62 = vld [vmem:[%s1095_s0 + $0x188] sm:$0xff]  ;;  %v37_v1 = vld [vmem:[%s1095_s0 + $0x80] sm:$0xff]  ;;  %v87_v7 = vld [vmem:[%s1096_s1 + $0x10] sm:$0xff] }
  0x22   :  { %597 = vmatpush.xpose.msk.msra.mxu0 %vm113_vm0, %v28_v32  ;;  %v53_v2 = vld [vmem:[%s1095_s0 + $0x100] sm:$0xff]  ;;  %v86_v6 = vld [vmem:[%s1096_s1 + $0x8] sm:$0xff]  ;;  %v88_v8 = vld [vmem:[%s1096_s1 + $0x18] sm:$0xff] }
  0x23   :  { %617 = vmatpush.xpose.msk.msra.mxu1 %vm113_vm0, %v44_v33  ;;  %v69_v3 = vld [vmem:[%s1095_s0 + $0x180] sm:$0xff] }
  0x24   :  { %637 = vmatpush.xpose.msk.msra.mxu2 %vm113_vm0, %v60_v34  ;;  %95 = vperm.xlu1 %682, %v89_v54   ;;  %v85_v4 = vld [vmem:[%s1096_s1] sm:$0xff] }
  0x25   :  { %657 = vmatpush.xpose.msk.msra.mxu3 %vm113_vm0, %v76_v35  ;;  %v452_v31 = vld [vmem:[%s1099_s4] sm:$0xff] }
  0x26   :  { %598 = vmatpush.xpose.msk.msra.mxu0 %vm113_vm0, %v27_v36  ;;  %456 = vperm.xlu2 %683, %v452_v31  }
  0x27   :  { %618 = vmatpush.xpose.msk.msra.mxu1 %vm113_vm0, %v43_v37 }
  0x28   :  { %638 = vmatpush.xpose.msk.msra.mxu2 %vm113_vm0, %v59_v38  ;;  %105 = vperm.xlu0 %681, %v91_v5   ;;  %v453_v38 = vld [vmem:[%s1099_s4 + $0x8] sm:$0xff] }
  0x29   :  { %658 = vmatpush.xpose.msk.msra.mxu3 %vm113_vm0, %v75_v39 }
  0x2a   :  { %599 = vmatpush.xpose.msk.msra.mxu0 %vm113_vm0, %v26_v41 }
  0x2b   :  { %619 = vmatpush.xpose.msk.msra.mxu1 %vm113_vm0, %v42_v42 }
  0x2c   :  { %639 = vmatpush.xpose.msk.msra.mxu2 %vm113_vm0, %v58_v43 }
  0x2d   :  { %659 = vmatpush.xpose.msk.msra.mxu3 %vm113_vm0, %v74_v44 }
  0x2e   :  { %600 = vmatpush.xpose.msk.msra.mxu0 %vm113_vm0, %v25_v46  ;;  %461 = vperm.xlu2 %683, %v453_v38  }
  0x2f   :  { %620 = vmatpush.xpose.msk.msra.mxu1 %vm113_vm0, %v41_v47 }
  0x30   :  { %640 = vmatpush.xpose.msk.msra.mxu2 %vm113_vm0, %v57_v48 }
  0x31   :  { %660 = vmatpush.xpose.msk.msra.mxu3 %vm113_vm0, %v73_v49 }
  0x32   :  { %601 = vmatpush.xpose.msk.msra.mxu0 %vm113_vm0, %v24_v50 }
  0x33   :  { %621 = vmatpush.xpose.msk.msra.mxu1 %vm113_vm0, %v40_v51 }
  0x34   :  { %641 = vmatpush.xpose.msk.msra.mxu2 %vm113_vm0, %v56_v52 }
  0x35   :  { %661 = vmatpush.xpose.msk.msra.mxu3 %vm113_vm0, %v72_v53 }
  0x36   :  { %602 = vmatpush.xpose.msk.msra.mxu0 %vm113_vm0, %v23_v55 }
  0x37   :  { %622 = vmatpush.xpose.msk.msra.mxu1 %vm113_vm0, %v39_v56  ;;  %v450_v56 = vld [vmem:[%s1098_s3] sm:$0xff] }
  0x38   :  { %642 = vmatpush.xpose.msk.msra.mxu2 %vm113_vm0, %v55_v57 }
  0x39   :  { %662 = vmatpush.xpose.msk.msra.mxu3 %vm113_vm0, %v71_v58 }
  0x3a   :  { %603 = vmatpush.xpose.msk.msra.mxu0 %vm113_vm0, %v22_v59 }
  0x3b   :  { %623 = vmatpush.xpose.msk.msra.mxu1 %vm113_vm0, %v38_v60 }
  0x3c   :  { %643 = vmatpush.xpose.msk.msra.mxu2 %vm113_vm0, %v54_v61 }
  0x3d   :  { %663 = vmatpush.xpose.msk.msra.mxu3 %vm113_vm0, %v70_v62 }
  0x3e   :  { %604 = vmatpush.xpose.msk.msra.mxu0 %vm113_vm0, %v21_v0  ;;  %v451_v0 = vld [vmem:[%s1098_s3 + $0x8] sm:$0xff]  ;;  %s743_s3 = smov [#allocation2]  }
  0x3f   :  { %624 = vmatpush.xpose.msk.msra.mxu1 %vm113_vm0, %v37_v1  ;;  %s575_s16 = sshll.u32 %s743_s3, 4  ;;  %s576_s16 = int_to_ptr.vmem [resolvable:$true] %s575_s16 }
  0x40   :  { %644 = vmatpush.xpose.msk.msra.mxu2 %vm113_vm0, %v53_v2 }
  0x41   :  { %664 = vmatpush.xpose.msk.msra.mxu3 %vm113_vm0, %v69_v3  ;;  %605 = vmatmul.msk.f32.vlgmr.msra.gmra.mxu0 %vm113_vm0, %v85_v4 }
  0x42   :  { %625 = vmatmul.msk.f32.vlgmr.msra.gmra.mxu1 %vm113_vm0, %v85_v4 }
  0x43   :  { %645 = vmatmul.msk.f32.vlgmr.msra.gmra.mxu2 %vm113_vm0, %v85_v4 }
  0x44   :  { %665 = vmatmul.msk.f32.vlgmr.msra.gmra.mxu3 %vm113_vm0, %v85_v4 }
  0x49   :  { %606 = vmatmul.msk.f32.gmra.mxu0 %vm113_vm0, %v86_v6 }
  0x4a   :  { %626 = vmatmul.msk.f32.gmra.mxu1 %vm113_vm0, %v86_v6 }
  0x4b   :  { %646 = vmatmul.msk.f32.gmra.mxu2 %vm113_vm0, %v86_v6 }
  0x4c   :  { %666 = vmatmul.msk.f32.gmra.mxu3 %vm113_vm0, %v86_v6 }
  0x51   :  { %607 = vmatmul.msk.f32.gmra.mxu0 %vm113_vm0, %v87_v7 }
  0x52   :  { %627 = vmatmul.msk.f32.gmra.mxu1 %vm113_vm0, %v87_v7 }
  0x53   :  { %647 = vmatmul.msk.f32.gmra.mxu2 %vm113_vm0, %v87_v7 }
  0x54   :  { %667 = vmatmul.msk.f32.gmra.mxu3 %vm113_vm0, %v87_v7 }
  0x59   :  { %608 = vmatmul.msk.f32.gmra.mxu0 %vm113_vm0, %v88_v8 }
  0x5a   :  { %628 = vmatmul.msk.f32.gmra.mxu1 %vm113_vm0, %v88_v8 }
  0x5b   :  { %648 = vmatmul.msk.f32.gmra.mxu2 %vm113_vm0, %v88_v8 }
  0x5c   :  { %668 = vmatmul.msk.f32.gmra.mxu3 %vm113_vm0, %v88_v8 }
  0x80   :  { %v457_v1 = vpop.permute.xlu2 %456 }
  0x88   :  { %v462_v6 = vpop.permute.xlu2 %461 }
  0x8e   :  { %v101_v15 = vpop.permute.xlu1 %100 }
  0x92   :  { %v111_v16 = vpop.permute.xlu0 %110 }
  0x96   :  { %v96_v21 = vpop.permute.xlu1 %95 }
  0x9a   :  { %v106_v28 = vpop.permute.xlu0 %105 }
  0xbe   :  { %v335_v9 = vpop.f32.mrf.mxu0 }
  0xbf   :  { %v364_v10 = vpop.f32.mrf.mxu1  ;;  %v336_v22 = vadd.f32 %v335_v9, %v96_v21 }
  0xc0   :  { %v365_v23 = vadd.f32 %v364_v10, %v96_v21 }
  0xc1   :  { %684 = vtanh.f32 %v336_v22 }
  0xc2   :  { %686 = vtanh.f32 %v365_v23 }
  0xc6   :  { %v393_v11 = vpop.f32.mrf.mxu2  ;;  %v338_v13 = vpop.f32.mrf.mxu0 }
  0xc7   :  { %v422_v12 = vpop.f32.mrf.mxu3  ;;  %v367_v14 = vpop.f32.mrf.mxu1  ;;  %v339_v34 = vadd.f32 %v338_v13, %v101_v15  ;;  %v394_v50 = vadd.f32 %v393_v11, %v96_v21 }
  0xc8   :  { %v368_v35 = vadd.f32 %v367_v14, %v101_v15  ;;  %v685_v39 = vpop.eup %684  ;;  %v423_v52 = vadd.f32 %v422_v12, %v96_v21 }
  0xc9   :  { %v687_v43 = vpop.eup %686 }
  0xce   :  { %v396_v17 = vpop.f32.mrf.mxu2  ;;  %v341_v19 = vpop.f32.mrf.mxu0 }
  0xcf   :  { %v425_v18 = vpop.f32.mrf.mxu3  ;;  %v370_v20 = vpop.f32.mrf.mxu1  ;;  %v342_v32 = vadd.f32 %v341_v19, %v106_v28  ;;  %v397_v46 = vadd.f32 %v396_v17, %v101_v15 }
  0xd0   :  { %v371_v33 = vadd.f32 %v370_v20, %v106_v28  ;;  %v426_v48 = vadd.f32 %v425_v18, %v101_v15 }
  0xd6   :  { %v399_v24 = vpop.f32.mrf.mxu2  ;;  %v344_v26 = vpop.f32.mrf.mxu0 }
  0xd7   :  { %v428_v25 = vpop.f32.mrf.mxu3  ;;  %v373_v27 = vpop.f32.mrf.mxu1  ;;  %v345_v29 = vadd.f32 %v344_v26, %v111_v16  ;;  %v400_v40 = vadd.f32 %v399_v24, %v106_v28 }
  0xd8   :  { %v374_v30 = vadd.f32 %v373_v27, %v111_v16  ;;  %v429_v44 = vadd.f32 %v428_v25, %v106_v28 }
  0xd9   :  { %688 = vtanh.f32 %v345_v29 }
  0xda   :  { %690 = vtanh.f32 %v374_v30 }
  0xdb   :  { %692 = vtanh.f32 %v342_v32 }
  0xdc   :  { %694 = vtanh.f32 %v371_v33 }
  0xdd   :  { %696 = vtanh.f32 %v339_v34 }
  0xde   :  { %v402_v36 = vpop.f32.mrf.mxu2  ;;  %698 = vtanh.f32 %v368_v35 }
  0xdf   :  { %v431_v37 = vpop.f32.mrf.mxu3  ;;  %v403_v41 = vadd.f32 %v402_v36, %v111_v16  ;;  %v689_v45 = vpop.eup %688 }
  0xe0   :  { %v432_v42 = vadd.f32 %v431_v37, %v111_v16  ;;  %v691_v47 = vpop.eup %690  ;;  %483 = vmatpush.msrb.mxu0 %v689_v45 }
  0xe1   :  { %700 = vtanh.f32 %v403_v41  ;;  %v693_v49 = vpop.eup %692  ;;  %506 = vmatpush.msrb.mxu1 %v691_v47 }
  0xe2   :  { %702 = vtanh.f32 %v432_v42  ;;  %v695_v51 = vpop.eup %694  ;;  %484 = vmatpush.msrb.mxu0 %v693_v49 }
  0xe3   :  { %704 = vtanh.f32 %v400_v40  ;;  %v697_v53 = vpop.eup %696  ;;  %507 = vmatpush.msrb.mxu1 %v695_v51 }
  0xe4   :  { %706 = vtanh.f32 %v429_v44  ;;  %v699_v54 = vpop.eup %698  ;;  %485 = vmatpush.msrb.mxu0 %v697_v53 }
  0xe5   :  { %708 = vtanh.f32 %v397_v46  ;;  %508 = vmatpush.msrb.mxu1 %v699_v54 }
  0xe6   :  { %710 = vtanh.f32 %v426_v48  ;;  %486 = vmatpush.msrb.mxu0 %v685_v39 }
  0xe7   :  { %v701_v55 = vpop.eup %700  ;;  %712 = vtanh.f32 %v394_v50  ;;  %509 = vmatpush.msrb.mxu1 %v687_v43  ;;  %669 = vmatmul.msk.f32.vlgmr.msrb.gmra.mxu0 %vm464_vm1, %v450_v56 }
  0xe8   :  { %v703_v57 = vpop.eup %702  ;;  %714 = vtanh.f32 %v423_v52  ;;  %529 = vmatpush.msrb.mxu2 %v701_v55  ;;  %671 = vmatmul.msk.f32.vlgmr.msrb.gmra.mxu1 %vm464_vm1, %v450_v56 }
  0xe9   :  { %v705_v58 = vpop.eup %704  ;;  %552 = vmatpush.msrb.mxu3 %v703_v57 }
  0xea   :  { %v707_v59 = vpop.eup %706  ;;  %530 = vmatpush.msrb.mxu2 %v705_v58 }
  0xeb   :  { %v709_v60 = vpop.eup %708  ;;  %553 = vmatpush.msrb.mxu3 %v707_v59 }
  0xec   :  { %v711_v61 = vpop.eup %710  ;;  %531 = vmatpush.msrb.mxu2 %v709_v60 }
  0xed   :  { %v713_v62 = vpop.eup %712  ;;  %554 = vmatpush.msrb.mxu3 %v711_v61 }
  0xee   :  { %v715_v63 = vpop.eup %714  ;;  %532 = vmatpush.msrb.mxu2 %v713_v62 }
  0xef   :  { %555 = vmatpush.msrb.mxu3 %v715_v63  ;;  %673 = vmatmul.msk.f32.vlgmr.msrb.gmra.mxu2 %vm464_vm1, %v450_v56 }
  0xf0   :  { %675 = vmatmul.msk.f32.vlgmr.msrb.gmra.mxu3 %vm464_vm1, %v450_v56  ;;  %670 = vmatmul.msk.f32.gmra.mxu0 %vm464_vm1, %v451_v0 }
  0xf1   :  { %672 = vmatmul.msk.f32.gmra.mxu1 %vm464_vm1, %v451_v0 }
  0xf7   :  { %674 = vmatmul.msk.f32.gmra.mxu2 %vm464_vm1, %v451_v0 }
  0xf8   :  { %676 = vmatmul.msk.f32.gmra.mxu3 %vm464_vm1, %v451_v0 }
 0x164   :  { %v488_v2 = vpop.f32.mrf.mxu0 }
 0x165   :  { %v489_v3 = vadd.f32 %v488_v2, %v457_v1  ;;  %v511_v4 = vpop.f32.mrf.mxu1 }
 0x166   :  { %v512_v5 = vadd.f32 %v511_v4, %v457_v1 }
 0x167   :  { %563 = vst [vmem:[#allocation2] sm:$0xff] %v489_v3 }
 0x168   :  { %564 = vst [vmem:[#allocation2 + $0x8] sm:$0xff] %v512_v5 }
 0x16d   :  { %v491_v7 = vpop.f32.mrf.mxu0 }
 0x16e   :  { %v492_v8 = vadd.f32 %v491_v7, %v462_v6  ;;  %v514_v9 = vpop.f32.mrf.mxu1 }
 0x16f   :  { %v515_v10 = vadd.f32 %v514_v9, %v462_v6 }
 0x170   :  { %567 = vst [vmem:[#allocation2 + $0x20] sm:$0xff] %v492_v8 }
 0x171   :  { %568 = vst [vmem:[#allocation2 + $0x28] sm:$0xff] %v515_v10 }
 0x172   :  { %v534_v11 = vpop.f32.mrf.mxu2 }
 0x173   :  { %v535_v12 = vadd.f32 %v534_v11, %v457_v1  ;;  %v557_v13 = vpop.f32.mrf.mxu3 }
 0x174   :  { %v558_v14 = vadd.f32 %v557_v13, %v457_v1 }
 0x175   :  { %565 = vst [vmem:[#allocation2 + $0x10] sm:$0xff] %v535_v12 }
 0x176   :  { %566 = vst [vmem:[#allocation2 + $0x18] sm:$0xff] %v558_v14 }
 0x17a   :  { %v537_v15 = vpop.f32.mrf.mxu2 }
 0x17b   :  { %v538_v16 = vadd.f32 %v537_v15, %v462_v6  ;;  %v560_v17 = vpop.f32.mrf.mxu3 }
 0x17c   :  { %v561_v18 = vadd.f32 %v560_v17, %v462_v6 }
 0x17d   :  { %569 = vst [vmem:[#allocation2 + $0x30] sm:$0xff] %v538_v16 }
 0x17e   :  { %570 = vst [vmem:[#allocation2 + $0x38] sm:$0xff] %v561_v18 }
 0x17f   :  { %583 = dma.vmem_to_hbm [thread:$0]  %s576_s16, 1024, %s578_s19, [#allocation3], %s744_s20, %s744_s20, %s745_s21  }
 0x180   :  { %740 = dma.done.wait [#allocation3], 1024  }
 0x181   :  { %741 = vsyncadd [#allocation3], 4294966272 }
 0x182   :  { %588 = vsyncpa [#allocation3], 1 }

</bundles_post_ra>
